<compile_context>
chip_gen: v7x
topology: tpu7x:2x2x1
jax: 0.10.0
libtpu: 0.0.40
codegen_flags: <defaults>
</compile_context>

<pallas_src>
import math

import jax
import jax.numpy as jnp
from jax import lax
from jax.experimental import pallas as pl
from jax.experimental.pallas import tpu as pltpu

# ---- ArcFace hyper-parameters (match the PyTorch module) -------------------
M = 0.5
S = 64.0
COS_M = math.cos(M)
SIN_M = math.sin(M)
TH = math.cos(math.pi - M)
MM = math.sin(math.pi - M) * M
EASY_MARGIN = False
EPS = 1e-12  # F.normalize default eps


def _round_up(x, m):
    return ((x + m - 1) // m) * m


def arc_margin_kernel(label_ref, xn_ref, w_ref, out_ref):
    # label_ref: (B, 1)   int32 labels (resident, same block every step)
    # xn_ref:    (B, E)   pre-L2-normalized embeddings, f32 (resident)
    # w_ref:     (TN, E)  one tile of class weights (f32 or bf16, streamed)
    # out_ref:   (B, TN)  output logits tile
    j = pl.program_id(0)
    tn = out_ref.shape[1]

    x_norm = xn_ref[...]                            # already normalized, f32
    w = w_ref[...].astype(jnp.float32)              # upcast bf16 -> f32 in VMEM

    # Un-normalized cosine on the MXU: (B, E) x (TN, E)^T -> (B, TN), f32 acc.
    cos_raw = lax.dot_general(
        x_norm, w,
        dimension_numbers=(((1,), (1,)), ((), ())),
        preferred_element_type=jnp.float32,
    )

    # Per-class squared norms reduced on the MXU directly into a (1, TN)
    # lane-major row: ones(1, E) @ (W*W)^T.  Scaling the (B, TN) cosine by
    # this row replaces rescaling the whole (TN, E) weight tile (saves a
    # full VPU pass + an f32 temporary) and needs no cross-lane relayout.
    w2 = w * w
    ones_row = jnp.ones((1, w.shape[1]), jnp.float32)
    w_sq = lax.dot_general(
        ones_row, w2,
        dimension_numbers=(((1,), (1,)), ((), ())),
        preferred_element_type=jnp.float32,
    )                                               # (1, TN)
    # F.normalize semantics: w / max(||w||, eps) == w * rsqrt(max(sum_sq, eps^2))
    inv_wn = lax.rsqrt(jnp.maximum(w_sq, EPS * EPS))
    cosine = cos_raw * inv_wn                       # (B, TN)

    # ArcFace margin (clamp 1 - cos^2 to avoid NaN when cosine rounds > 1).
    sine = jnp.sqrt(jnp.maximum(1.0 - cosine * cosine, 0.0))
    phi = cosine * COS_M - sine * SIN_M
    if EASY_MARGIN:
        phi = jnp.where(cosine > 0.0, phi, cosine)
    else:
        phi = jnp.where(cosine > TH, phi, cosine - MM)

    # One-hot blend as a single select: class id of column c is j*TN + c.
    labels = label_ref[...]                          # (B, 1) int32
    col_ids = lax.broadcasted_iota(jnp.int32, cosine.shape, 1) + j * tn
    out = jnp.where(col_ids == labels, phi, cosine) * S
    out_ref[...] = out.astype(out_ref.dtype)


def arc_margin_forward(inp, weight, label, *, tile_n=None,
                       vmem_budget_bytes=32 << 20):
    """ArcFace head forward.

    inp:    (B, E) float embeddings
    weight: (C, E) class weights (f32, or bf16 for halved HBM traffic —
            the kernel upcasts to f32 internally)
    label:  (B,)   int class indices
    Returns (logits (B, C) float32, label).

    vmem_budget_bytes bounds the weight pipeline (double-buffered HBM stream
    + in-kernel f32 temporaries).  The 32 MiB default keeps the kernel well
    inside v7x's 64 MiB VMEM/TC; on v5e/v6e (128 MiB) it can be raised for
    even fewer grid steps.
    """
    B, E = inp.shape
    C, E2 = weight.shape
    assert E == E2

    itemsize = int(jnp.dtype(weight.dtype).itemsize)

    # --- pick the class tile size from the VMEM budget ----------------------
    # Per weight element per tile we need: 2 buffers of the streamed dtype
    # (BlockSpec double-buffering) + ~8 bytes of f32 temporaries in the body
    # (upcast tile + squared tile; the allocator reuses them once dead).
    per_elem_bytes = 2 * itemsize + 8
    if tile_n is None:
        max_tile = vmem_budget_bytes // (per_elem_bytes * E)
        max_tile = max((max_tile // 128) * 128, 128)
        tile_n = min(max_tile, _round_up(C, 128))
    assert tile_n % 128 == 0, "tile_n must be a multiple of 128"

    # Pad the class dim with zero rows so it tiles evenly (padded columns
    # produce finite values and are sliced off; labels never hit them).
    c_pad = _round_up(C, tile_n)
    w_in = weight if c_pad == C else jnp.pad(weight, ((0, c_pad - C), (0, 0)))

    # --- hoist the x normalization out of the per-tile loop (O(B*E) once) ---
    x32 = inp.astype(jnp.float32)
    x_sq = jnp.sum(x32 * x32, axis=1, keepdims=True)
    x_norm = x32 * lax.rsqrt(jnp.maximum(x_sq, EPS * EPS))

    label2d = label.reshape(B, 1).astype(jnp.int32)

    # --- explicit scoped-VMEM limit sized to the actual footprint -----------
    w_stream_bytes = 2 * tile_n * E * itemsize        # double-buffered W tiles
    w_temp_bytes = 2 * tile_n * E * 4                 # f32 upcast + squared tile
    out_buf_bytes = 2 * B * tile_n * 4                # double-buffered out tiles
    x_buf_bytes = 2 * (B * E * 4 + B * 4)             # x_norm + labels (resident)
    misc_bytes = 4 * B * tile_n * 4                   # (B, TN) f32 temporaries
    vmem_limit = int(w_stream_bytes + w_temp_bytes + out_buf_bytes
                     + x_buf_bytes + misc_bytes) + (4 << 20)
    vmem_limit = min(max(vmem_limit, 32 << 20), 128 << 20)

    grid = (c_pad // tile_n,)
    out = pl.pallas_call(
        arc_margin_kernel,
        out_shape=jax.ShapeDtypeStruct((B, c_pad), jnp.float32),
        grid_spec=pltpu.PrefetchScalarGridSpec(
            num_scalar_prefetch=0,
            grid=grid,
            in_specs=[
                pl.BlockSpec((B, 1), lambda j: (0, 0)),        # labels (resident)
                pl.BlockSpec((B, E), lambda j: (0, 0)),        # x_norm (resident)
                pl.BlockSpec((tile_n, E), lambda j: (j, 0)),   # weight tile (stream)
            ],
            out_specs=pl.BlockSpec((B, tile_n), lambda j: (0, j)),
        ),
        compiler_params=pltpu.CompilerParams(
            dimension_semantics=("parallel",),   # shards class tiles on v7x megacore
            vmem_limit_bytes=vmem_limit,
        ),
    )(label2d, x_norm, w_in)

    if c_pad != C:
        out = out[:, :C]
    return out, label


def reference_forward(inp, weight, label):
    x = inp / jnp.maximum(jnp.linalg.norm(inp, axis=1, keepdims=True), EPS)
    w = weight / jnp.maximum(jnp.linalg.norm(weight, axis=1, keepdims=True), EPS)
    cosine = x @ w.T
    sine = jnp.sqrt(jnp.maximum(1.0 - cosine ** 2, 0.0))
    phi = cosine * COS_M - sine * SIN_M
    phi = jnp.where(cosine > TH, phi, cosine - MM)
    one_hot = jax.nn.one_hot(label, weight.shape[0], dtype=jnp.float32)
    return (one_hot * phi + (1.0 - one_hot) * cosine) * S


if __name__ == "__main__":
    # Small, deterministic synthetic shapes.
    B = 8            # batch
    EMB_SIZE = 64    # embedding dim
    NUM_CLASSES = 256

    key = jax.random.PRNGKey(0)
    k_x, k_w, k_l = jax.random.split(key, 3)

    inp = jax.random.normal(k_x, (B, EMB_SIZE), dtype=jnp.float32)

    # xavier_uniform_ init for weight (NUM_CLASSES, EMB_SIZE):
    limit = math.sqrt(6.0 / (NUM_CLASSES + EMB_SIZE))
    weight = jax.random.uniform(
        k_w, (NUM_CLASSES, EMB_SIZE), dtype=jnp.float32,
        minval=-limit, maxval=limit)

    label = jax.random.randint(k_l, (B,), 0, NUM_CLASSES, dtype=jnp.int32)

    # 1) f32 weights: match against the PyTorch-semantics reference.
    logits, label_out = arc_margin_forward(inp, weight, label)
    logits = jax.block_until_ready(logits)
    ref = reference_forward(inp, weight, label)
    assert logits.shape == (B, NUM_CLASSES)
    assert jnp.allclose(logits, ref, atol=2e-4, rtol=2e-4), \
        float(jnp.max(jnp.abs(logits - ref)))
    assert bool(jnp.all(label_out == label))

    # 2) bf16-streamed weights (the HBM-bound production path): kernel upcasts
    #    in VMEM; compare against a reference fed the same bf16-rounded W.
    w_bf16 = weight.astype(jnp.bfloat16)
    logits_bf16, _ = arc_margin_forward(inp, w_bf16, label)
    logits_bf16 = jax.block_until_ready(logits_bf16)
    ref_bf16 = reference_forward(inp, w_bf16.astype(jnp.float32), label)
    assert jnp.all(jnp.isfinite(logits_bf16))
    assert jnp.allclose(logits_bf16, ref_bf16, atol=5e-3, rtol=5e-3), \
        float(jnp.max(jnp.abs(logits_bf16 - ref_bf16)))

    # 3) class count not a multiple of the tile (exercises the padding path).
    C3 = 384
    w3 = jax.random.uniform(k_w, (C3, EMB_SIZE), dtype=jnp.float32,
                            minval=-limit, maxval=limit)
    l3 = jax.random.randint(k_l, (B,), 0, C3, dtype=jnp.int32)
    logits3, _ = arc_margin_forward(inp, w3, l3, tile_n=256)
    logits3 = jax.block_until_ready(logits3)
    ref3 = reference_forward(inp, w3, l3)
    assert logits3.shape == (B, C3)
    assert jnp.allclose(logits3, ref3, atol=2e-4, rtol=2e-4), \
        float(jnp.max(jnp.abs(logits3 - ref3)))

    print("KERNEL_OK")
</pallas_src>

<mosaic_0001>
module attributes {stable_mosaic.version = 11 : i64} {
  func.func @arc_margin_kernel(%arg0: i32, %arg1: memref<8x1xi32, #tpu.memory_space<vmem>>, %arg2: memref<8x64xf32, #tpu.memory_space<vmem>>, %arg3: memref<256x64xf32, #tpu.memory_space<vmem>>, %arg4: memref<8x256xf32, #tpu.memory_space<vmem>>) attributes {dimension_semantics = [#tpu.dimension_semantics<parallel>], iteration_bounds = array<i64: 1>, scalar_prefetch = 0 : i64, scratch_operands = 0 : i64, tpu.core_type = #tpu.core_type<tc>, window_params = [{pipeline_mode = #tpu.pipeline_mode<synchronous>, transform_indices = @transform_0, window_bounds = array<i64: 8, 1>}, {pipeline_mode = #tpu.pipeline_mode<synchronous>, transform_indices = @transform_1, window_bounds = array<i64: 8, 64>}, {transform_indices = @transform_2, window_bounds = array<i64: 256, 64>}, {transform_indices = @transform_3, window_bounds = array<i64: 8, 256>}]} {
    %c0 = arith.constant 0 : index
    %c0_0 = arith.constant 0 : index
    %0 = vector.load %arg2[%c0, %c0_0] : memref<8x64xf32, #tpu.memory_space<vmem>>, vector<8x64xf32>
    %c0_1 = arith.constant 0 : index
    %c0_2 = arith.constant 0 : index
    %1 = vector.load %arg3[%c0_1, %c0_2] : memref<256x64xf32, #tpu.memory_space<vmem>>, vector<256x64xf32>
    %cst = arith.constant dense<0.000000e+00> : vector<8x256xf32>
    %2 = tpu.matmul %0, %1, %cst {dimension_numbers = #tpu.dot_dimension_numbers<[1], [1], [0], [0], [0, 0, 1, 0], [], []>} : vector<8x64xf32>, vector<256x64xf32>, vector<8x256xf32> -> vector<8x256xf32>
    %3 = arith.mulf %1, %1 : vector<256x64xf32>
    %cst_3 = arith.constant 1.000000e+00 : f32
    %4 = vector.broadcast %cst_3 : f32 to vector<1x64xf32>
    %cst_4 = arith.constant dense<0.000000e+00> : vector<1x256xf32>
    %5 = tpu.matmul %4, %3, %cst_4 {dimension_numbers = #tpu.dot_dimension_numbers<[1], [1], [0], [0], [0, 0, 1, 0], [], []>} : vector<1x64xf32>, vector<256x64xf32>, vector<1x256xf32> -> vector<1x256xf32>
    %cst_5 = arith.constant 1.000000e-24 : f32
    %6 = vector.broadcast %cst_5 : f32 to vector<1x256xf32>
    %7 = arith.maximumf %5, %6 : vector<1x256xf32>
    %8 = math.rsqrt %7 : vector<1x256xf32>
    %9 = vector.broadcast %8 : vector<1x256xf32> to vector<8x256xf32>
    %10 = arith.mulf %2, %9 : vector<8x256xf32>
    %11 = arith.mulf %10, %10 : vector<8x256xf32>
    %cst_6 = arith.constant 1.000000e+00 : f32
    %12 = vector.broadcast %cst_6 : f32 to vector<8x256xf32>
    %13 = arith.subf %12, %11 : vector<8x256xf32>
    %cst_7 = arith.constant 0.000000e+00 : f32
    %14 = vector.broadcast %cst_7 : f32 to vector<8x256xf32>
    %15 = arith.maximumf %13, %14 : vector<8x256xf32>
    %16 = math.sqrt %15 : vector<8x256xf32>
    %cst_8 = arith.constant 0.87758255 : f32
    %17 = vector.broadcast %cst_8 : f32 to vector<8x256xf32>
    %18 = arith.mulf %10, %17 : vector<8x256xf32>
    %cst_9 = arith.constant 0.47942555 : f32
    %19 = vector.broadcast %cst_9 : f32 to vector<8x256xf32>
    %20 = arith.mulf %16, %19 : vector<8x256xf32>
    %21 = arith.subf %18, %20 : vector<8x256xf32>
    %cst_10 = arith.constant -0.87758255 : f32
    %22 = vector.broadcast %cst_10 : f32 to vector<8x256xf32>
    %23 = arith.cmpf ogt, %10, %22 : vector<8x256xf32>
    %cst_11 = arith.constant 0.239712775 : f32
    %24 = vector.broadcast %cst_11 : f32 to vector<8x256xf32>
    %25 = arith.subf %10, %24 : vector<8x256xf32>
    %26 = arith.select %23, %21, %25 : vector<8x256xi1>, vector<8x256xf32>
    %c0_12 = arith.constant 0 : index
    %c0_13 = arith.constant 0 : index
    %27 = vector.load %arg1[%c0_12, %c0_13] : memref<8x1xi32, #tpu.memory_space<vmem>>, vector<8x1xi32>
    %28 = tpu.iota {dimensions = array<i32: 1>} : vector<8x256xi32>
    %c256_i32 = arith.constant 256 : i32
    %29 = arith.muli %arg0, %c256_i32 : i32
    %30 = vector.broadcast %29 : i32 to vector<8x256xi32>
    %31 = arith.addi %28, %30 : vector<8x256xi32>
    %32 = vector.broadcast %27 : vector<8x1xi32> to vector<8x256xi32>
    %33 = arith.cmpi eq, %31, %32 : vector<8x256xi32>
    %34 = arith.select %33, %26, %10 : vector<8x256xi1>, vector<8x256xf32>
    %cst_14 = arith.constant 6.400000e+01 : f32
    %35 = vector.broadcast %cst_14 : f32 to vector<8x256xf32>
    %36 = arith.mulf %34, %35 : vector<8x256xf32>
    %c0_15 = arith.constant 0 : index
    %c0_16 = arith.constant 0 : index
    %37 = vector.load %arg4[%c0_15, %c0_16] : memref<8x256xf32, #tpu.memory_space<vmem>>, vector<8x256xf32>
    tpu.vector_store %arg4[%c0_15, %c0_16], %36 {strides = array<i32>} : memref<8x256xf32, #tpu.memory_space<vmem>>, vector<8x256xf32>,
    return
  }
  func.func @transform_0(%arg0: i32) -> (i32, i32) {
    %c0_i32 = arith.constant 0 : i32
    %c0_i32_0 = arith.constant 0 : i32
    %c0_i32_1 = arith.constant 0 : i32
    return %c0_i32, %c0_i32_0 : i32, i32
  }
  func.func @transform_1(%arg0: i32) -> (i32, i32) {
    %c0_i32 = arith.constant 0 : i32
    %c0_i32_0 = arith.constant 0 : i32
    %c0_i32_1 = arith.constant 0 : i32
    return %c0_i32, %c0_i32_0 : i32, i32
  }
  func.func @transform_2(%arg0: i32) -> (i32, i32) {
    %c0_i32 = arith.constant 0 : i32
    %c0_i32_0 = arith.constant 0 : i32
    return %arg0, %c0_i32 : i32, i32
  }
  func.func @transform_3(%arg0: i32) -> (i32, i32) {
    %c0_i32 = arith.constant 0 : i32
    %c0_i32_0 = arith.constant 0 : i32
    return %c0_i32, %arg0 : i32, i32
  }
}

</mosaic_0001>

<bundles_post_ra>
// kernel: tpu_custom_call.1
= control target key start
LH: loop header
LB: loop body
LE: loop exit
PB: predicated region body
PF: predicated region fallthrough
CT: control target
= control target key end

     0   :  { %vm48_vm0 = vcmask 523264   ;;  %v768_v9 = vmov 1.0   ;;  %v769_v15 = vmov 0   ;;  %s985_s0 = inlined_call_operand.vmem [shape: s32[8,1], index: 0, kind: input, shape index: {}]   ;;  %s986_s1 = inlined_call_operand.vmem [shape: f32[8,64], index: 1, kind: input, shape index: {}]   ;;  %s987_s2 = inlined_call_operand.vmem [shape: f32[256,64], index: 2, kind: input, shape index: {}]   ;;  %s988_s3 = inlined_call_operand.hbm [shape: f32[8,256], index: 3, kind: output, shape index: {}]  }
   0x1   :  { %v32_v0 = vld [vmem:[%s987_s2 + $0x80] sm:$0xff]  ;;  %v33_v1 = vld [vmem:[%s987_s2 + $0x88] sm:$0xff]  ;;  %v34_v7 = vld [vmem:[%s987_s2 + $0x90] sm:$0xff]  ;;  %634 = vmatprep.mubr.msk.f32.mxu1 %vm48_vm0, %v768_v9  ;;  %735 = vset.pattern.permute.xlu0 %v769_v15 }
   0x2   :  { %v16_v2 = vld [vmem:[%s987_s2] sm:$0xff]  ;;  %v235_v3 = vmul.f32 %v32_v0, %v32_v0  ;;  %v236_v4 = vmul.f32 %v33_v1, %v33_v1  ;;  %v17_v5 = vld [vmem:[%s987_s2 + $0x8] sm:$0xff]  ;;  %v636_v8 = vpack.c.bf16 %v33_v1, %v32_v0  ;;  %vm810_vm1 = vmpackc.low %vm48_vm0, %vm48_vm0  ;;  %v237_v13 = vmul.f32 %v34_v7, %v34_v7 }
   0x3   :  { %v219_v6 = vmul.f32 %v16_v2, %v16_v2  ;;  %v220_v11 = vmul.f32 %v17_v5, %v17_v5  ;;  %v35_v12 = vld [vmem:[%s987_s2 + $0x98] sm:$0xff]  ;;  %v639_v14 = vpack.c.bf16 %v17_v5, %v16_v2  ;;  %v18_v18 = vld [vmem:[%s987_s2 + $0x10] sm:$0xff]  ;;  %v36_v21 = vld [vmem:[%s987_s2 + $0xa0] sm:$0xff] }
   0x4   :  { %v684_v16 = vpack.c.bf16 %v236_v4, %v235_v3  ;;  %v238_v17 = vmul.f32 %v35_v12, %v35_v12  ;;  %v19_v19 = vld [vmem:[%s987_s2 + $0x18] sm:$0xff]  ;;  %638 = vmatprep.subr.msk.bf16.mxu0 %vm810_vm1, %v636_v8  ;;  %v37_v22 = vld [vmem:[%s987_s2 + $0xa8] sm:$0xff]  ;;  %v642_v24 = vpack.c.bf16 %v35_v12, %v34_v7  ;;  %v221_v25 = vmul.f32 %v18_v18, %v18_v18  ;;  %v20_v33 = vld [vmem:[%s987_s2 + $0x20] sm:$0xff] }
   0x5   :  { %v687_v20 = vpack.c.bf16 %v220_v11, %v219_v6  ;;  %641 = vmatpush3.bf16.xpose.msk.msra.mxu0 %vm810_vm1, %v639_v14  ;;  %v222_v26 = vmul.f32 %v19_v19, %v19_v19  ;;  %v239_v27 = vmul.f32 %v36_v21, %v36_v21  ;;  %v240_v28 = vmul.f32 %v37_v22, %v37_v22  ;;  %v21_v34 = vld [vmem:[%s987_s2 + $0x28] sm:$0xff] }
   0x6   :  { %686 = vmatprep.subr.msk.bf16.mxu1 %vm810_vm1, %v684_v16  ;;  %v690_v23 = vpack.c.bf16 %v238_v17, %v237_v13  ;;  %644 = vmatprep.subr.msk.bf16.mxu0 %vm810_vm1, %v642_v24  ;;  %v645_v29 = vpack.c.bf16 %v19_v19, %v18_v18  ;;  %v648_v30 = vpack.c.bf16 %v37_v22, %v36_v21 }
   0x7   :  { %689 = vmatpush3.bf16.xpose.msk.msra.mxu1 %vm810_vm1, %v687_v20  ;;  %v693_v31 = vpack.c.bf16 %v222_v26, %v221_v25  ;;  %v696_v32 = vpack.c.bf16 %v240_v28, %v239_v27 }
   0x8   :  { %692 = vmatprep.subr.msk.bf16.mxu1 %vm810_vm1, %v690_v23 }
   0x9   :  { %8 = vsyncpa [#allocation3], 0  ;;  %v38_v35 = vld [vmem:[%s987_s2 + $0xb0] sm:$0xff]  ;;  %v39_v36 = vld [vmem:[%s987_s2 + $0xb8] sm:$0xff]  ;;  %v223_v38 = vmul.f32 %v20_v33, %v20_v33  ;;  %v224_v39 = vmul.f32 %v21_v34, %v21_v34  ;;  %v651_v43 = vpack.c.bf16 %v21_v34, %v20_v33 }
   0xa   :  { %v860_v37 = vld [vmem:[%s986_s1] sm:$0xff]  ;;  %v241_v41 = vmul.f32 %v38_v35, %v38_v35  ;;  %v242_v42 = vmul.f32 %v39_v36, %v39_v36  ;;  %v654_v44 = vpack.c.bf16 %v39_v36, %v38_v35  ;;  %v22_v47 = vld [vmem:[%s987_s2 + $0x30] sm:$0xff]  ;;  %v23_v48 = vld [vmem:[%s987_s2 + $0x38] sm:$0xff] }
   0xb   :  { %v467_v40 = vld [vmem:[%s985_s0] sm:$0xff]  ;;  %600 = vmatprep.mubr.msk.f32.mxu0 %vm48_vm0, %v860_v37  ;;  %v699_v45 = vpack.c.bf16 %v224_v39, %v223_v38  ;;  %v41_v50 = vld [vmem:[%s987_s2 + $0xc8] sm:$0xff]  ;;  %v225_v51 = vmul.f32 %v22_v47, %v22_v47  ;;  %v226_v52 = vmul.f32 %v23_v48, %v23_v48  ;;  %v657_v55 = vpack.c.bf16 %v23_v48, %v22_v47  ;;  %v42_v61 = vld [vmem:[%s987_s2 + $0xd0] sm:$0xff] }
   0xc   :  { %476 = vperm.xlu0 %735, %v467_v40   ;;  %v702_v46 = vpack.c.bf16 %v242_v42, %v241_v41  ;;  %v40_v49 = vld [vmem:[%s987_s2 + $0xc0] sm:$0xff]  ;;  %v244_v54 = vmul.f32 %v41_v50, %v41_v50  ;;  %v25_v60 = vld [vmem:[%s987_s2 + $0x48] sm:$0xff]  ;;  %v43_v62 = vld [vmem:[%s987_s2 + $0xd8] sm:$0xff]  ;;  %v245_v1 = vmul.f32 %v42_v61, %v42_v61 }
   0xd   :  { %647 = vmatpush3.bf16.xpose.msk.msra.mxu0 %vm810_vm1, %v645_v29  ;;  %v243_v53 = vmul.f32 %v40_v49, %v40_v49  ;;  %v660_v56 = vpack.c.bf16 %v41_v50, %v40_v49  ;;  %v705_v57 = vpack.c.bf16 %v226_v52, %v225_v51  ;;  %v24_v59 = vld [vmem:[%s987_s2 + $0x40] sm:$0xff]  ;;  %v228_v0 = vmul.f32 %v25_v60, %v25_v60  ;;  %v26_v7 = vld [vmem:[%s987_s2 + $0x50] sm:$0xff]  ;;  %v27_v8 = vld [vmem:[%s987_s2 + $0x58] sm:$0xff] }
   0xe   :  { %650 = vmatprep.subr.msk.bf16.mxu0 %vm810_vm1, %v648_v30  ;;  %v227_v63 = vmul.f32 %v24_v59, %v24_v59  ;;  %v246_v2 = vmul.f32 %v43_v62, %v43_v62  ;;  %v663_v3 = vpack.c.bf16 %v25_v60, %v24_v59  ;;  %v666_v4 = vpack.c.bf16 %v43_v62, %v42_v61  ;;  %v44_v11 = vld [vmem:[%s987_s2 + $0xe0] sm:$0xff]  ;;  %v45_v12 = vld [vmem:[%s987_s2 + $0xe8] sm:$0xff]  ;;  %v46_v23 = vld [vmem:[%s987_s2 + $0xf0] sm:$0xff] }
   0xf   :  { %695 = vmatpush3.bf16.xpose.msk.msra.mxu1 %vm810_vm1, %v693_v31  ;;  %v708_v58 = vpack.c.bf16 %v244_v54, %v243_v53  ;;  %v229_v13 = vmul.f32 %v26_v7, %v26_v7  ;;  %v230_v14 = vmul.f32 %v27_v8, %v27_v8  ;;  %v247_v15 = vmul.f32 %v44_v11, %v44_v11  ;;  %v28_v21 = vld [vmem:[%s987_s2 + $0x60] sm:$0xff]  ;;  %v29_v22 = vld [vmem:[%s987_s2 + $0x68] sm:$0xff]  ;;  %v47_v24 = vld [vmem:[%s987_s2 + $0xf8] sm:$0xff] }
  0x10   :  { %698 = vmatprep.subr.msk.bf16.mxu1 %vm810_vm1, %v696_v32  ;;  %v711_v5 = vpack.c.bf16 %v228_v0, %v227_v63  ;;  %v714_v6 = vpack.c.bf16 %v246_v2, %v245_v1  ;;  %v248_v16 = vmul.f32 %v45_v12, %v45_v12  ;;  %v669_v17 = vpack.c.bf16 %v27_v8, %v26_v7  ;;  %v30_v33 = vld [vmem:[%s987_s2 + $0x70] sm:$0xff]  ;;  %v31_v34 = vld [vmem:[%s987_s2 + $0x78] sm:$0xff]  ;;  %s770_s2 = smov [#allocation2]  }
  0x11   :  { %v672_v18 = vpack.c.bf16 %v45_v12, %v44_v11  ;;  %v717_v19 = vpack.c.bf16 %v230_v14, %v229_v13  ;;  %v231_v25 = vmul.f32 %v28_v21, %v28_v21  ;;  %v232_v26 = vmul.f32 %v29_v22, %v29_v22  ;;  %s492_s22 = sshll.u32 %s770_s2, 4  ;;  %s493_s22 = int_to_ptr.vmem [resolvable:$true] %s492_s22 }
  0x12   :  { %v720_v20 = vpack.c.bf16 %v248_v16, %v247_v15  ;;  %v249_v27 = vmul.f32 %v46_v23, %v46_v23  ;;  %v250_v28 = vmul.f32 %v47_v24, %v47_v24  ;;  %v675_v29 = vpack.c.bf16 %v29_v22, %v28_v21  ;;  %s744_s23 = scalar_lea.vmem %s493_s22, 256  ;;  %p749_p1 = scmp.lt.s32.totalorder %s493_s22, %s493_s22 }
  0x13   :  { %v678_v30 = vpack.c.bf16 %v47_v24, %v46_v23  ;;  %v723_v31 = vpack.c.bf16 %v232_v26, %v231_v25  ;;  %v233_v35 = vmul.f32 %v30_v33, %v30_v33  ;;  %v234_v36 = vmul.f32 %v31_v34, %v31_v34  ;;  %p745_p0 = scmp.ne.s32.totalorder %s493_s22, %s744_s23  ;;  %p750_p2 = scmp.lt.s32.totalorder %s744_s23, %s744_s23 }
  0x14   :  { %v726_v32 = vpack.c.bf16 %v250_v28, %v249_v27  ;;  %v681_v38 = vpack.c.bf16 %v31_v34, %v30_v33 }
  0x15   :  { %653 = vmatpush3.bf16.xpose.msk.msra.mxu0 %vm810_vm1, %v651_v43  ;;  %v729_v39 = vpack.c.bf16 %v234_v36, %v233_v35  ;;  %p751_p3 = por %p750_p2, %p749_p1 }
  0x16   :  { %656 = vmatprep.subr.msk.bf16.mxu0 %vm810_vm1, %v654_v44 }
  0x17   :  { %701 = vmatpush3.bf16.xpose.msk.msra.mxu1 %vm810_vm1, %v699_v45  ;;  %p752_p4 = pnand %p751_p3, %p745_p0 }
  0x18   :  { %704 = vmatprep.subr.msk.bf16.mxu1 %vm810_vm1, %v702_v46  ;;  %v425_v46 = vlaneseq }
  0x1a   :  { %v426_v47 = vshrl.u32 %v425_v46, 7  ;;  %v469_v59 = vand.u32 127, %v425_v46 }
  0x1c   :  { %v427_v48 = vsub.s32 0, %v426_v47 }
  0x1d   :  { %659 = vmatpush3.bf16.xpose.msk.msra.mxu0 %vm810_vm1, %v657_v55 }
  0x1e   :  { %662 = vmatprep.subr.msk.bf16.mxu0 %vm810_vm1, %v660_v56 }
  0x1f   :  { %707 = vmatpush3.bf16.xpose.msk.msra.mxu1 %vm810_vm1, %v705_v57 }
  0x20   :  { %710 = vmatprep.subr.msk.bf16.mxu1 %vm810_vm1, %v708_v58 }
  0x25   :  { %665 = vmatpush3.bf16.xpose.msk.msra.mxu0 %vm810_vm1, %v663_v3 }
  0x26   :  { %668 = vmatprep.subr.msk.bf16.mxu0 %vm810_vm1, %v666_v4 }
  0x27   :  { %713 = vmatpush3.bf16.xpose.msk.msra.mxu1 %vm810_vm1, %v711_v5  ;;  %v470_v5 = vadd.s32 128, %v469_v59 }
  0x28   :  { %716 = vmatprep.subr.msk.bf16.mxu1 %vm810_vm1, %v714_v6 }
  0x2d   :  { %671 = vmatpush3.bf16.xpose.msk.msra.mxu0 %vm810_vm1, %v669_v17 }
  0x2e   :  { %674 = vmatprep.subr.msk.bf16.mxu0 %vm810_vm1, %v672_v18 }
  0x2f   :  { %719 = vmatpush3.bf16.xpose.msk.msra.mxu1 %vm810_vm1, %v717_v19 }
  0x30   :  { %722 = vmatprep.subr.msk.bf16.mxu1 %vm810_vm1, %v720_v20 }
  0x35   :  { %677 = vmatpush3.bf16.xpose.msk.msra.mxu0 %vm810_vm1, %v675_v29 }
  0x36   :  { %680 = vmatprep.subr.msk.bf16.mxu0 %vm810_vm1, %v678_v30 }
  0x37   :  { %725 = vmatpush3.bf16.xpose.msk.msra.mxu1 %vm810_vm1, %v723_v31 }
  0x38   :  { %728 = vmatprep.subr.msk.bf16.mxu1 %vm810_vm1, %v726_v32 }
  0x3d   :  { %683 = vmatpush3.bf16.xpose.msk.msra.mxu0 %vm810_vm1, %v681_v38 }
  0x3f   :  { %731 = vmatpush3.bf16.xpose.msk.msra.mxu1 %vm810_vm1, %v729_v39 }
  0x44   :  { %601 = vmatmul.mubr.msk.f32.vlgmr.msra.gmra.mrb[0].mxu0 %vm48_vm0, %v860_v37 }
  0x46   :  { %635 = vmatmul.mubr.msk.f32.vlgmr.msra.gmra.mrb[0].mxu1 %vm48_vm0, %v768_v9 }
  0x8b   :  { %v477_v2 = vpop.permute.xlu0 %476 }
  0x8c   :  { %vm478_vm6 = vcmp.eq.s32.totalorder %v469_v59, %v477_v2  ;;  %vm479_vm8 = vcmp.eq.s32.totalorder %v470_v5, %v477_v2 }
 0x117   :  { %v214_v40 = vpop.f32.mrb[0].mxu0 }
 0x118   :  { %v216_v41 = vpop.f32.mrb[1].mxu0 }
 0x119   :  { %v416_v42 = vpop.f32.mrb[0].mxu1 }
 0x11a   :  { %v421_v43 = vmax.f32 %v416_v42, 1e-24  ;;  %v418_v44 = vpop.f32.mrb[1].mxu1 }
 0x11b   :  { %v422_v45 = vmax.f32 %v418_v44, 1e-24 }
 0x11c   :  { %736 = vrsqrt.f32 %v421_v43 }
 0x11d   :  { %738 = vrsqrt.f32 %v422_v45 }
 0x126   :  { %v737_v49 = vpop.eup %736 }
 0x127   :  { %v739_v10 = vpop.eup %738  ;;  %v428_v50 = vrot.slane %v737_v49, %v427_v48 }
 0x128   :  { %v432_v51 = vrot.slane %v739_v10, %v427_v48 }
 0x129   :  { %v433_v52 = vmul.f32 %v428_v50, %v214_v40 }
 0x12a   :  { %v434_v37 = vmul.f32 %v432_v51, %v216_v41 }
 0x12b   :  { %v435_v53 = vmul.f32 %v433_v52, %v433_v52  ;;  %v455_v7 = vmul.f32 0.87758255, %v433_v52  ;;  %v566_v14 = vadd.f32 -0.23971277, %v433_v52  ;;  %vm461_vm7 = vcmp.gt.f32.partialorder %v433_v52, -0.87758255 }
 0x12c   :  { %v436_v54 = vmul.f32 %v434_v37, %v434_v37  ;;  %v456_v11 = vmul.f32 0.87758255, %v434_v37  ;;  %v567_v16 = vadd.f32 -0.23971277, %v434_v37  ;;  %vm462_vm9 = vcmp.gt.f32.partialorder %v434_v37, -0.87758255 }
 0x12d   :  { %v437_v9 = vsub.f32 1.0, %v435_v53 }
 0x12e   :  { %v438_v55 = vsub.f32 1.0, %v436_v54 }
 0x12f   :  { %v439_v56 = vmax.f32 %v437_v9, 0.0 }
 0x130   :  { %v440_v57 = vmax.f32 %v438_v55, 0.0 }
 0x131   :  { %740 = vrsqrt.f32 %v439_v56  ;;  %vm443_vm2 = vcmp.eq.f32.partialorder %v439_v56, inf  ;;  %v446_v62 = vand.u32 2147483648, %v439_v56  ;;  %vm445_vm3 = vcmp.eq.f32.partialorder %v439_v56, 0.0 }
 0x132   :  { %742 = vrsqrt.f32 %v440_v57  ;;  %vm450_vm4 = vcmp.eq.f32.partialorder %v440_v57, inf  ;;  %v453_v1 = vand.u32 2147483648, %v440_v57  ;;  %vm452_vm5 = vcmp.eq.f32.partialorder %v440_v57, 0.0 }
 0x13b   :  { %v741_v58 = vpop.eup %740 }
 0x13c   :  { %v743_v60 = vpop.eup %742  ;;  %v442_v61 = vmul.f32 %v741_v58, %v439_v56 }
 0x13d   :  { %v449_v63 = vmul.f32 %v743_v60, %v440_v57 }
 0x13e   :  { %v444_v0 = vsel %vm443_vm2, %v439_v56, %v442_v61 }
 0x13f   :  { %v447_v3 = vsel %vm445_vm3, %v446_v62, %v444_v0  ;;  %v451_v4 = vsel %vm450_vm4, %v440_v57, %v449_v63 }
 0x140   :  { %v454_v6 = vsel %vm452_vm5, %v453_v1, %v451_v4  ;;  %v457_v8 = vmul.f32 0.47942555, %v447_v3 }
 0x141   :  { %v458_v12 = vmul.f32 0.47942555, %v454_v6 }
 0x142   :  { %v459_v13 = vsub.f32 %v455_v7, %v457_v8 }
 0x143   :  { %v460_v15 = vsub.f32 %v456_v11, %v458_v12 }
 0x144   :  { %v465_v17 = vsel %vm461_vm7, %v459_v13, %v566_v14 }
 0x145   :  { %v466_v18 = vsel %vm462_vm9, %v460_v15, %v567_v16  ;;  %v480_v19 = vsel %vm478_vm6, %v465_v17, %v433_v52 }
 0x146   :  { %v481_v20 = vsel %vm479_vm8, %v466_v18, %v434_v37  ;;  %v482_v21 = vmul.f32 64.0, %v480_v19 }
 0x147   :  { %v483_v22 = vmul.f32 64.0, %v481_v20 }
 0x148   :  { %484 = vst [vmem:[#allocation2] sm:$0xff] %v482_v21 }
 0x149   :  { %485 = vst [vmem:[#allocation2 + $0x8] sm:$0xff] %v483_v22 }
 0x14a   :  { %755 = shalt.err (!%p752_p4)
}
 0x14b   :  { %s756_s26 = scalar_lea.hbm %s988_s3, 256 }
 0x14c   :  { %p757_p5 = scmp.ne.s32.totalorder %s988_s3, %s756_s26  ;;  %p760_p6 = scmp.lt.u32.totalorder %s756_s26, %s988_s3 }
 0x14e   :  { %p762_p7 = pnand %p760_p6, %p757_p5 }
 0x150   :  { %765 = shalt.err (!%p762_p7)
}
 0x151   :  { %495 = dma.vmem_to_hbm [thread:$0]  %s493_s22, 256, %s988_s3, [#allocation3]  }
 0x152   :  { %766 = dma.done.wait [#allocation3], 256  }
 0x153   :  { %767 = vsyncadd [#allocation3], 4294967040 }
 0x154   :  { %499 = vsyncpa [#allocation3], 1 }

</bundles_post_ra>
